<compile_context>
chip_gen: v7x
topology: tpu7x:2x2x1
jax: 0.10.0
libtpu: 0.0.40
codegen_flags: <defaults>
</compile_context>

<pallas_src>
import functools

import jax
import jax.numpy as jnp
from jax.experimental import pallas as pl
from jax.experimental.pallas import tpu as pltpu


_LANE = 128      # lane width: feature / K dims padded to multiples of this
_SUBLANE = 8     # f32 sublane: batch tiles are multiples of this


def _round_up(n, m):
    return ((n + m - 1) // m) * m


def _vmem_cap_bytes():
    """Physical VMEM capacity of the current TPU generation (fallback 64 MiB)."""
    try:
        return int(pltpu.get_tpu_info().vmem_capacity_bytes)
    except Exception:
        return 64 << 20      # conservative: assume v7x-sized VMEM


# ----------------------------- Pallas kernel ------------------------------ #
def _cdecoder_kernel(xc_ref, w1_ref, b1_ref, w2_ref, b2_ref, w3_ref, b3_ref,
                     w4_ref, b4_ref, out_ref):
    """One batch tile of the fused decoder MLP.

    xc_ref: (TB, Kp)  [x | c | 0-pad] in the matmul dtype
    w*_ref: lane-padded weights (matmul dtype), VMEM-resident across the grid
    b*_ref: (1, F) f32 biases (b1 already contains the class-0 embedding term)
    out_ref:(TB, Op) f32 lane-dense output tile (wrapper slices column padding)
    """
    mdt = w1_ref.dtype   # MXU operand dtype; accumulation stays f32 throughout

    # fc1 + ReLU   (class embedding lives in w1's last real row + b1)
    h = jnp.dot(xc_ref[...], w1_ref[...], preferred_element_type=jnp.float32)
    h = jnp.maximum(h + b1_ref[...], 0.0)

    # fc_h1 + ReLU
    h = jnp.dot(h.astype(mdt), w2_ref[...], preferred_element_type=jnp.float32)
    h = jnp.maximum(h + b2_ref[...], 0.0)

    # fc_h2 + ReLU
    h = jnp.dot(h.astype(mdt), w3_ref[...], preferred_element_type=jnp.float32)
    h = jnp.maximum(h + b3_ref[...], 0.0)

    # fc2 (no activation)
    out = jnp.dot(h.astype(mdt), w4_ref[...],
                  preferred_element_type=jnp.float32) + b4_ref[...]
    out_ref[...] = out.astype(out_ref.dtype)


# ------------------- one-time parameter preparation ----------------------- #
def prepare_params(params, matmul_dtype=jnp.bfloat16):
    """Fold the embedding into fc1, lane-pad and cast all weights (one time).

    Returns a dict of arrays ready for cdecoder_forward. Run once and reuse;
    this keeps the per-call hot path free of weight-sized HBM passes.
    """
    f32 = jnp.float32
    mdt = jnp.dtype(matmul_dtype)

    emb = params["emb"]                            # (2, emb_dim)
    w1 = params["w1"]                              # (latent + emb_dim, hidden)
    latent = w1.shape[0] - emb.shape[1]
    hidden = w1.shape[1]
    hidden2 = params["w2"].shape[1]
    out_dim = params["w4"].shape[1]

    Kp = _round_up(latent + 1, _LANE)              # [x | c] padded K
    Hp = _round_up(hidden, _LANE)
    H2p = _round_up(hidden2, _LANE)
    Op = _round_up(out_dim, _LANE)

    # Fold Embedding(2, E) + concat through fc1:
    #   [x, emb[c]] @ W1 + b1 == x @ W1[:latent] + c * delta + cls_bias[0]
    # for c in {0, 1}, where cls_bias[k] = emb[k] @ W1[latent:] + b1.
    cls_bias = (emb.astype(f32) @ w1[latent:, :].astype(f32)
                + params["b1"].astype(f32))        # (2, hidden)
    delta = cls_bias[1:2, :] - cls_bias[0:1, :]    # (1, hidden)
    b1_eff = jnp.pad(cls_bias[0:1, :], ((0, 0), (0, Hp - hidden)))

    w1_aug = jnp.concatenate([w1[:latent, :].astype(f32), delta], axis=0)
    w1p = jnp.pad(w1_aug, ((0, Kp - (latent + 1)), (0, Hp - hidden))).astype(mdt)
    w2p = jnp.pad(params["w2"], ((0, Hp - hidden), (0, H2p - hidden2))).astype(mdt)
    w3p = jnp.pad(params["w3"], ((0, H2p - hidden2), (0, Hp - hidden))).astype(mdt)
    w4p = jnp.pad(params["w4"], ((0, Hp - hidden), (0, Op - out_dim))).astype(mdt)
    b2p = jnp.pad(params["b2"].astype(f32), ((0, 0), (0, H2p - hidden2)))
    b3p = jnp.pad(params["b3"].astype(f32), ((0, 0), (0, Hp - hidden)))
    b4p = jnp.pad(params["b4"].astype(f32), ((0, 0), (0, Op - out_dim)))

    return dict(w1=w1p, b1=b1_eff, w2=w2p, b2=b2p, w3=w3p, b3=b3p,
                w4=w4p, b4=b4p)


# -------------------------------- forward ---------------------------------- #
@functools.partial(jax.jit, static_argnames=("out_dim", "block_rows"))
def cdecoder_forward(x, c, prepared, *, out_dim, block_rows=1024):
    """Forward pass matching CDecoder.forward.

    Args:
      x: (B, latent_dim) float32
      c: (B,) int class labels in {0, 1}
      prepared: output of prepare_params(params, matmul_dtype)
      out_dim: unpadded output feature count (static)
      block_rows: batch-tile upper bound (static)
    Returns:
      x_hat: (B, out_dim) float32
    """
    B, latent = x.shape
    w1 = prepared["w1"]
    Kp, Hp = w1.shape
    H2p = prepared["w2"].shape[1]
    Op = prepared["w4"].shape[1]
    mdt = w1.dtype
    f32 = jnp.float32

    # [x | c | 0-pad] in the matmul dtype: one lane-dense slab, no separate
    # (TB, 1) DMA for c and no per-tile blend FMA in the kernel.
    xc = jnp.concatenate(
        [x.astype(mdt), c.astype(mdt).reshape(B, 1),
         jnp.zeros((B, Kp - latent - 1), mdt)], axis=1)

    # Batch tiling: at least 2 tiles when B allows (so "parallel" semantics can
    # spread tiles over v7x's two TensorCores), capped by block_rows.
    TB = min(block_rows, _round_up(max(-(-B // 2), 1), _SUBLANE))
    TB = max(_SUBLANE, _round_up(TB, _SUBLANE))

    # VMEM budget: weights/biases use constant index_maps (never re-DMA'd), so
    # they are charged once; only the per-tile I/O slabs are double-buffered.
    itm = jnp.dtype(mdt).itemsize
    w_bytes = (Kp * Hp + Hp * H2p + H2p * Hp + Hp * Op) * itm
    b_bytes = (2 * Hp + H2p + Op) * 4
    cap = min(100 << 20, max(_vmem_cap_bytes() - (16 << 20), 16 << 20))

    def footprint(tb):
        io = 2 * tb * (Kp * itm + Op * 4)            # double-buffered in/out
        act = tb * (2 * Hp + H2p + Op) * 4           # f32 intermediates
        return w_bytes + b_bytes + io + act + (4 << 20)

    while footprint(TB) > cap and TB > _SUBLANE:
        TB = max(_SUBLANE, _round_up(TB // 2, _SUBLANE))
    vmem_limit = int(min(cap, footprint(TB)))

    grid = (pl.cdiv(B, TB),)   # no batch padding: partial edge tile is masked

    out = pl.pallas_call(
        _cdecoder_kernel,
        out_shape=jax.ShapeDtypeStruct((B, Op), f32),
        grid=grid,
        in_specs=[
            pl.BlockSpec((TB, Kp), lambda i: (i, 0)),    # [x | c] tile
            pl.BlockSpec((Kp, Hp), lambda i: (0, 0)),    # w1 (+ class-delta row)
            pl.BlockSpec((1, Hp), lambda i: (0, 0)),     # b1 (class-0 bias)
            pl.BlockSpec((Hp, H2p), lambda i: (0, 0)),   # w2
            pl.BlockSpec((1, H2p), lambda i: (0, 0)),    # b2
            pl.BlockSpec((H2p, Hp), lambda i: (0, 0)),   # w3
            pl.BlockSpec((1, Hp), lambda i: (0, 0)),     # b3
            pl.BlockSpec((Hp, Op), lambda i: (0, 0)),    # w4
            pl.BlockSpec((1, Op), lambda i: (0, 0)),     # b4
        ],
        out_specs=pl.BlockSpec((TB, Op), lambda i: (i, 0)),
        compiler_params=pltpu.CompilerParams(
            dimension_semantics=("parallel",),
            vmem_limit_bytes=vmem_limit),
    )(xc, prepared["w1"], prepared["b1"], prepared["w2"], prepared["b2"],
      prepared["w3"], prepared["b3"], prepared["w4"], prepared["b4"])

    return out if Op == out_dim else out[:, :out_dim]


# ----------------------- deterministic parameter init --------------------- #
def init_params(key, latent_dim, hidden_dim, output_dim, emb_dim):
    """Mimic PyTorch default inits deterministically (synthetic weights)."""
    ks = jax.random.split(key, 9)

    def linear(kw, kb, fan_in, fan_out):
        bound = 1.0 / jnp.sqrt(fan_in)
        w = jax.random.uniform(kw, (fan_in, fan_out), jnp.float32, -bound, bound)
        b = jax.random.uniform(kb, (1, fan_out), jnp.float32, -bound, bound)
        return w, b

    emb = jax.random.normal(ks[0], (2, emb_dim), jnp.float32)  # nn.Embedding ~ N(0,1)
    w1, b1 = linear(ks[1], ks[2], latent_dim + emb_dim, hidden_dim)
    w2, b2 = linear(ks[3], ks[4], hidden_dim, 2 * hidden_dim)
    w3, b3 = linear(ks[5], ks[6], 2 * hidden_dim, hidden_dim)
    w4, b4 = linear(ks[7], ks[8], hidden_dim, output_dim)
    return dict(emb=emb, w1=w1, b1=b1, w2=w2, b2=b2, w3=w3, b3=b3, w4=w4, b4=b4)


# ------------------------------ reference --------------------------------- #
def cdecoder_reference(x, c, params):
    """Faithful (unfused) port of the PyTorch forward, for validation."""
    c_emb = jnp.take(params["emb"], c.astype(jnp.int32), axis=0)
    h = jnp.concatenate([x, c_emb], axis=1)
    h = jax.nn.relu(h @ params["w1"] + params["b1"])
    h = jax.nn.relu(h @ params["w2"] + params["b2"])
    h = jax.nn.relu(h @ params["w3"] + params["b3"])
    return h @ params["w4"] + params["b4"]


if __name__ == "__main__":
    latent_dim, hidden_dim, output_dim, emb_dim = 8, 32, 16, 8
    batch = 8

    key = jax.random.PRNGKey(0)
    kp, kx, kc = jax.random.split(key, 3)

    params = init_params(kp, latent_dim, hidden_dim, output_dim, emb_dim)
    x = jax.random.normal(kx, (batch, latent_dim), jnp.float32)
    c = jax.random.bernoulli(kc, 0.5, (batch,)).astype(jnp.int32)
    ref = cdecoder_reference(x, c, params)

    # f32 MXU operands: tight check against the PyTorch-style reference.
    prep_f32 = prepare_params(params, matmul_dtype=jnp.float32)
    out = jax.block_until_ready(
        cdecoder_forward(x, c, prep_f32, out_dim=output_dim))
    assert out.shape == (batch, output_dim)
    assert jnp.allclose(out, ref, atol=1e-4, rtol=1e-4), \
        float(jnp.max(jnp.abs(out - ref)))

    # bf16 MXU operands (default / production path): loose tolerance.
    prep_bf16 = prepare_params(params)
    out_bf = jax.block_until_ready(
        cdecoder_forward(x, c, prep_bf16, out_dim=output_dim))
    assert out_bf.shape == (batch, output_dim)
    assert jnp.allclose(out_bf, ref, atol=5e-2, rtol=5e-2), \
        float(jnp.max(jnp.abs(out_bf - ref)))

    # Ragged batch (B=5): single partial tile, exercises masked edge stores.
    x2 = jax.random.normal(jax.random.PRNGKey(1), (5, latent_dim), jnp.float32)
    c2 = jnp.array([0, 1, 1, 0, 1], jnp.int32)
    out2 = jax.block_until_ready(
        cdecoder_forward(x2, c2, prep_f32, out_dim=output_dim))
    ref2 = cdecoder_reference(x2, c2, params)
    assert out2.shape == (5, output_dim)
    assert jnp.allclose(out2, ref2, atol=1e-4, rtol=1e-4)

    # Multi-tile grid with a partial last tile (B=37, 16-row tiles).
    x3 = jax.random.normal(jax.random.PRNGKey(2), (37, latent_dim), jnp.float32)
    c3 = jax.random.bernoulli(jax.random.PRNGKey(3), 0.5, (37,)).astype(jnp.int32)
    out3 = jax.block_until_ready(
        cdecoder_forward(x3, c3, prep_f32, out_dim=output_dim, block_rows=16))
    ref3 = cdecoder_reference(x3, c3, params)
    assert out3.shape == (37, output_dim)
    assert jnp.allclose(out3, ref3, atol=1e-4, rtol=1e-4)

    print("KERNEL_OK")
</pallas_src>

<mosaic_0001>
module attributes {stable_mosaic.version = 11 : i64} {
  func.func @_cdecoder_kernel(%arg0: i32, %arg1: memref<8x128xf32, #tpu.memory_space<vmem>>, %arg2: memref<128x128xf32, #tpu.memory_space<vmem>>, %arg3: memref<1x128xf32, #tpu.memory_space<vmem>>, %arg4: memref<128x128xf32, #tpu.memory_space<vmem>>, %arg5: memref<1x128xf32, #tpu.memory_space<vmem>>, %arg6: memref<128x128xf32, #tpu.memory_space<vmem>>, %arg7: memref<1x128xf32, #tpu.memory_space<vmem>>, %arg8: memref<128x128xf32, #tpu.memory_space<vmem>>, %arg9: memref<1x128xf32, #tpu.memory_space<vmem>>, %arg10: memref<8x128xf32, #tpu.memory_space<vmem>>) attributes {dimension_semantics = [#tpu.dimension_semantics<parallel>], iteration_bounds = array<i64: 1>, scalar_prefetch = 0 : i64, scratch_operands = 0 : i64, tpu.core_type = #tpu.core_type<tc>, window_params = [{transform_indices = @transform_0, window_bounds = array<i64: 8, 128>}, {pipeline_mode = #tpu.pipeline_mode<synchronous>, transform_indices = @transform_1, window_bounds = array<i64: 128, 128>}, {pipeline_mode = #tpu.pipeline_mode<synchronous>, transform_indices = @transform_2, window_bounds = array<i64: 1, 128>}, {pipeline_mode = #tpu.pipeline_mode<synchronous>, transform_indices = @transform_3, window_bounds = array<i64: 128, 128>}, {pipeline_mode = #tpu.pipeline_mode<synchronous>, transform_indices = @transform_4, window_bounds = array<i64: 1, 128>}, {pipeline_mode = #tpu.pipeline_mode<synchronous>, transform_indices = @transform_5, window_bounds = array<i64: 128, 128>}, {pipeline_mode = #tpu.pipeline_mode<synchronous>, transform_indices = @transform_6, window_bounds = array<i64: 1, 128>}, {pipeline_mode = #tpu.pipeline_mode<synchronous>, transform_indices = @transform_7, window_bounds = array<i64: 128, 128>}, {pipeline_mode = #tpu.pipeline_mode<synchronous>, transform_indices = @transform_8, window_bounds = array<i64: 1, 128>}, {transform_indices = @transform_9, window_bounds = array<i64: 8, 128>}]} {
    %c0 = arith.constant 0 : index
    %c0_0 = arith.constant 0 : index
    %0 = vector.load %arg1[%c0, %c0_0] : memref<8x128xf32, #tpu.memory_space<vmem>>, vector<8x128xf32>
    %c0_1 = arith.constant 0 : index
    %c0_2 = arith.constant 0 : index
    %1 = vector.load %arg2[%c0_1, %c0_2] : memref<128x128xf32, #tpu.memory_space<vmem>>, vector<128x128xf32>
    %cst = arith.constant dense<0.000000e+00> : vector<8x128xf32>
    %2 = tpu.matmul %0, %1, %cst {dimension_numbers = #tpu.dot_dimension_numbers<[1], [0], [0], [1], [0, 0, 1, 1], [], []>} : vector<8x128xf32>, vector<128x128xf32>, vector<8x128xf32> -> vector<8x128xf32>
    %c0_3 = arith.constant 0 : index
    %c0_4 = arith.constant 0 : index
    %3 = vector.load %arg3[%c0_3, %c0_4] : memref<1x128xf32, #tpu.memory_space<vmem>>, vector<1x128xf32>
    %4 = vector.broadcast %3 : vector<1x128xf32> to vector<8x128xf32>
    %5 = arith.addf %2, %4 : vector<8x128xf32>
    %cst_5 = arith.constant 0.000000e+00 : f32
    %6 = vector.broadcast %cst_5 : f32 to vector<8x128xf32>
    %7 = arith.maximumf %5, %6 : vector<8x128xf32>
    %c0_6 = arith.constant 0 : index
    %c0_7 = arith.constant 0 : index
    %8 = vector.load %arg4[%c0_6, %c0_7] : memref<128x128xf32, #tpu.memory_space<vmem>>, vector<128x128xf32>
    %cst_8 = arith.constant dense<0.000000e+00> : vector<8x128xf32>
    %9 = tpu.matmul %7, %8, %cst_8 {dimension_numbers = #tpu.dot_dimension_numbers<[1], [0], [0], [1], [0, 0, 1, 1], [], []>} : vector<8x128xf32>, vector<128x128xf32>, vector<8x128xf32> -> vector<8x128xf32>
    %c0_9 = arith.constant 0 : index
    %c0_10 = arith.constant 0 : index
    %10 = vector.load %arg5[%c0_9, %c0_10] : memref<1x128xf32, #tpu.memory_space<vmem>>, vector<1x128xf32>
    %11 = vector.broadcast %10 : vector<1x128xf32> to vector<8x128xf32>
    %12 = arith.addf %9, %11 : vector<8x128xf32>
    %cst_11 = arith.constant 0.000000e+00 : f32
    %13 = vector.broadcast %cst_11 : f32 to vector<8x128xf32>
    %14 = arith.maximumf %12, %13 : vector<8x128xf32>
    %c0_12 = arith.constant 0 : index
    %c0_13 = arith.constant 0 : index
    %15 = vector.load %arg6[%c0_12, %c0_13] : memref<128x128xf32, #tpu.memory_space<vmem>>, vector<128x128xf32>
    %cst_14 = arith.constant dense<0.000000e+00> : vector<8x128xf32>
    %16 = tpu.matmul %14, %15, %cst_14 {dimension_numbers = #tpu.dot_dimension_numbers<[1], [0], [0], [1], [0, 0, 1, 1], [], []>} : vector<8x128xf32>, vector<128x128xf32>, vector<8x128xf32> -> vector<8x128xf32>
    %c0_15 = arith.constant 0 : index
    %c0_16 = arith.constant 0 : index
    %17 = vector.load %arg7[%c0_15, %c0_16] : memref<1x128xf32, #tpu.memory_space<vmem>>, vector<1x128xf32>
    %18 = vector.broadcast %17 : vector<1x128xf32> to vector<8x128xf32>
    %19 = arith.addf %16, %18 : vector<8x128xf32>
    %cst_17 = arith.constant 0.000000e+00 : f32
    %20 = vector.broadcast %cst_17 : f32 to vector<8x128xf32>
    %21 = arith.maximumf %19, %20 : vector<8x128xf32>
    %c0_18 = arith.constant 0 : index
    %c0_19 = arith.constant 0 : index
    %22 = vector.load %arg8[%c0_18, %c0_19] : memref<128x128xf32, #tpu.memory_space<vmem>>, vector<128x128xf32>
    %cst_20 = arith.constant dense<0.000000e+00> : vector<8x128xf32>
    %23 = tpu.matmul %21, %22, %cst_20 {dimension_numbers = #tpu.dot_dimension_numbers<[1], [0], [0], [1], [0, 0, 1, 1], [], []>} : vector<8x128xf32>, vector<128x128xf32>, vector<8x128xf32> -> vector<8x128xf32>
    %c0_21 = arith.constant 0 : index
    %c0_22 = arith.constant 0 : index
    %24 = vector.load %arg9[%c0_21, %c0_22] : memref<1x128xf32, #tpu.memory_space<vmem>>, vector<1x128xf32>
    %25 = vector.broadcast %24 : vector<1x128xf32> to vector<8x128xf32>
    %26 = arith.addf %23, %25 : vector<8x128xf32>
    %c0_23 = arith.constant 0 : index
    %c0_24 = arith.constant 0 : index
    %27 = vector.load %arg10[%c0_23, %c0_24] : memref<8x128xf32, #tpu.memory_space<vmem>>, vector<8x128xf32>
    tpu.vector_store %arg10[%c0_23, %c0_24], %26 {strides = array<i32>} : memref<8x128xf32, #tpu.memory_space<vmem>>, vector<8x128xf32>,
    return
  }
  func.func @transform_0(%arg0: i32) -> (i32, i32) {
    %c0_i32 = arith.constant 0 : i32
    %c0_i32_0 = arith.constant 0 : i32
    return %arg0, %c0_i32 : i32, i32
  }
  func.func @transform_1(%arg0: i32) -> (i32, i32) {
    %c0_i32 = arith.constant 0 : i32
    %c0_i32_0 = arith.constant 0 : i32
    %c0_i32_1 = arith.constant 0 : i32
    return %c0_i32, %c0_i32_0 : i32, i32
  }
  func.func @transform_2(%arg0: i32) -> (i32, i32) {
    %c0_i32 = arith.constant 0 : i32
    %c0_i32_0 = arith.constant 0 : i32
    %c0_i32_1 = arith.constant 0 : i32
    return %c0_i32, %c0_i32_0 : i32, i32
  }
  func.func @transform_3(%arg0: i32) -> (i32, i32) {
    %c0_i32 = arith.constant 0 : i32
    %c0_i32_0 = arith.constant 0 : i32
    %c0_i32_1 = arith.constant 0 : i32
    return %c0_i32, %c0_i32_0 : i32, i32
  }
  func.func @transform_4(%arg0: i32) -> (i32, i32) {
    %c0_i32 = arith.constant 0 : i32
    %c0_i32_0 = arith.constant 0 : i32
    %c0_i32_1 = arith.constant 0 : i32
    return %c0_i32, %c0_i32_0 : i32, i32
  }
  func.func @transform_5(%arg0: i32) -> (i32, i32) {
    %c0_i32 = arith.constant 0 : i32
    %c0_i32_0 = arith.constant 0 : i32
    %c0_i32_1 = arith.constant 0 : i32
    return %c0_i32, %c0_i32_0 : i32, i32
  }
  func.func @transform_6(%arg0: i32) -> (i32, i32) {
    %c0_i32 = arith.constant 0 : i32
    %c0_i32_0 = arith.constant 0 : i32
    %c0_i32_1 = arith.constant 0 : i32
    return %c0_i32, %c0_i32_0 : i32, i32
  }
  func.func @transform_7(%arg0: i32) -> (i32, i32) {
    %c0_i32 = arith.constant 0 : i32
    %c0_i32_0 = arith.constant 0 : i32
    %c0_i32_1 = arith.constant 0 : i32
    return %c0_i32, %c0_i32_0 : i32, i32
  }
  func.func @transform_8(%arg0: i32) -> (i32, i32) {
    %c0_i32 = arith.constant 0 : i32
    %c0_i32_0 = arith.constant 0 : i32
    %c0_i32_1 = arith.constant 0 : i32
    return %c0_i32, %c0_i32_0 : i32, i32
  }
  func.func @transform_9(%arg0: i32) -> (i32, i32) {
    %c0_i32 = arith.constant 0 : i32
    %c0_i32_0 = arith.constant 0 : i32
    return %arg0, %c0_i32 : i32, i32
  }
}

</mosaic_0001>

<bundles_post_ra>
// kernel: cdecoder_forward.1
= control target key start
LH: loop header
LB: loop body
LE: loop exit
PB: predicated region body
PF: predicated region fallthrough
CT: control target
= control target key end

     0   :  { %14 = vsyncpa [#allocation3], 0  ;;  %s1119_s0 = inlined_call_operand.vmem [shape: f32[8,128], index: 0, kind: input, shape index: {}]   ;;  %s1120_s1 = inlined_call_operand.hbm [shape: f32[128,128], index: 1, kind: input, shape index: {}]   ;;  %s1121_s2 = inlined_call_operand.vmem [shape: f32[1,128], index: 2, kind: input, shape index: {}]   ;;  %s1122_s3 = inlined_call_operand.hbm [shape: f32[128,128], index: 3, kind: input, shape index: {}]   ;;  %s1123_s4 = inlined_call_operand.vmem [shape: f32[1,128], index: 4, kind: input, shape index: {}]   ;;  %s1124_s5 = inlined_call_operand.hbm [shape: f32[128,128], index: 5, kind: input, shape index: {}]   ;;  %s1125_s6 = inlined_call_operand.vmem [shape: f32[1,128], index: 6, kind: input, shape index: {}]   ;;  %s1126_s7 = inlined_call_operand.hbm [shape: f32[128,128], index: 7, kind: input, shape index: {}]   ;;  %s1127_s8 = inlined_call_operand.vmem [shape: f32[1,128], index: 8, kind: input, shape index: {}]   ;;  %s1128_s9 = inlined_call_operand.hbm [shape: f32[8,128], index: 9, kind: output, shape index: {}]  }
   0x1   :  { %15 = vsyncpa [#allocation6], 0 }
   0x2   :  { %16 = vsyncpa [#allocation9], 0 }
   0x3   :  { %17 = vsyncpa [#allocation4], 0  ;;  %s918_s30 = smov [#allocation5]   ;;  %s919_s11 = smov [#allocation2]  }
   0x4   :  { %s39_s10 = sshll.u32 %s918_s30, 4  ;;  %s25_s12 = sshll.u32 %s919_s11, 4  ;;  %s40_s10 = int_to_ptr.vmem [resolvable:$true] %s39_s10  ;;  %s978_s12 = int_to_ptr.vmem [resolvable:$true] %s25_s12 }
   0x5   :  { %s800_s15 = scalar_lea.hbm %s1122_s3, 2048 }
   0x6   :  { %p801_p0 = scmp.ne.s32.totalorder %s1122_s3, %s800_s15  ;;  %p804_p1 = scmp.lt.u32.totalorder %s800_s15, %s1122_s3 }
   0x8   :  { %p806_p2 = pnand %p804_p1, %p801_p0 }
   0xa   :  { %809 = shalt.err (!%p806_p2)
}
   0xb   :  { %s810_s20 = scalar_lea.vmem %s40_s10, 2048  ;;  %p815_p4 = scmp.lt.s32.totalorder %s40_s10, %s40_s10 }
   0xc   :  { %p811_p3 = scmp.ne.s32.totalorder %s40_s10, %s810_s20  ;;  %p816_p5 = scmp.lt.s32.totalorder %s810_s20, %s810_s20 }
   0xe   :  { %p817_p6 = por %p816_p5, %p815_p4 }
  0x10   :  { %p818_p7 = pnand %p817_p6, %p811_p3 }
  0x12   :  { %821 = shalt.err (!%p818_p7)
}
  0x13   :  { %s920_s21 = smov 128   ;;  %s921_s22 = smov 8  }
  0x14   :  { %45 = dma.hbm_to_vmem [thread:$0]  %s1122_s3, 2048, %s40_s10, [#allocation6], %s920_s21, %s920_s21, %s921_s22  }
  0x15   :  { %s822_s27 = scalar_lea.hbm %s1120_s1, 2048 }
  0x16   :  { %p823_p8 = scmp.ne.s32.totalorder %s1120_s1, %s822_s27  ;;  %p826_p9 = scmp.lt.u32.totalorder %s822_s27, %s1120_s1 }
  0x18   :  { %p828_p10 = pnand %p826_p9, %p823_p8 }
  0x1a   :  { %831 = shalt.err (!%p828_p10)
}
  0x1b   :  { %s832_s13 = scalar_lea.vmem %s978_s12, 2048  ;;  %p837_p12 = scmp.lt.s32.totalorder %s978_s12, %s978_s12 }
  0x1c   :  { %p833_p11 = scmp.ne.s32.totalorder %s978_s12, %s832_s13  ;;  %p838_p13 = scmp.lt.s32.totalorder %s832_s13, %s832_s13 }
  0x1e   :  { %p839_p0 = por %p838_p13, %p837_p12 }
  0x20   :  { %p840_p1 = pnand %p839_p0, %p833_p11 }
  0x22   :  { %843 = shalt.err (!%p840_p1)
}
  0x23   :  { %31 = dma.hbm_to_vmem [thread:$0]  %s1120_s1, 2048, %s978_s12, [#allocation3], %s920_s21, %s920_s21, %s921_s22  }
  0x24   :  { %s922_s14 = smov [#allocation7]   ;;  %s923_s16 = smov [#allocation8]  }
  0x25   :  { %s53_s15 = sshll.u32 %s922_s14, 4  ;;  %s67_s17 = sshll.u32 %s923_s16, 4  ;;  %s54_s15 = int_to_ptr.vmem [resolvable:$true] %s53_s15  ;;  %s1015_s17 = int_to_ptr.vmem [resolvable:$true] %s67_s17 }
  0x26   :  { %s844_s20 = scalar_lea.hbm %s1124_s5, 2048 }
  0x27   :  { %p845_p2 = scmp.ne.s32.totalorder %s1124_s5, %s844_s20  ;;  %p848_p3 = scmp.lt.u32.totalorder %s844_s20, %s1124_s5 }
  0x29   :  { %p850_p4 = pnand %p848_p3, %p845_p2 }
  0x2b   :  { %853 = shalt.err (!%p850_p4)
}
  0x2c   :  { %s854_s1 = scalar_lea.vmem %s54_s15, 2048  ;;  %p859_p6 = scmp.lt.s32.totalorder %s54_s15, %s54_s15 }
  0x2d   :  { %p855_p5 = scmp.ne.s32.totalorder %s54_s15, %s854_s1  ;;  %p860_p7 = scmp.lt.s32.totalorder %s854_s1, %s854_s1 }
  0x2f   :  { %p861_p8 = por %p860_p7, %p859_p6 }
  0x31   :  { %p862_p9 = pnand %p861_p8, %p855_p5 }
  0x33   :  { %865 = shalt.err (!%p862_p9)
}
  0x34   :  { %59 = dma.hbm_to_vmem [thread:$0]  %s1124_s5, 2048, %s54_s15, [#allocation6], %s920_s21, %s920_s21, %s921_s22  }
  0x35   :  { %s866_s30 = scalar_lea.hbm %s1126_s7, 2048 }
  0x36   :  { %p867_p10 = scmp.ne.s32.totalorder %s1126_s7, %s866_s30  ;;  %p870_p11 = scmp.lt.u32.totalorder %s866_s30, %s1126_s7 }
  0x38   :  { %p872_p12 = pnand %p870_p11, %p867_p10 }
  0x3a   :  { %875 = shalt.err (!%p872_p12)
}
  0x3b   :  { %s876_s14 = scalar_lea.vmem %s1015_s17, 2048  ;;  %p881_p0 = scmp.lt.s32.totalorder %s1015_s17, %s1015_s17 }
  0x3c   :  { %p877_p13 = scmp.ne.s32.totalorder %s1015_s17, %s876_s14  ;;  %p882_p1 = scmp.lt.s32.totalorder %s876_s14, %s876_s14 }
  0x3e   :  { %p883_p2 = por %p882_p1, %p881_p0 }
  0x40   :  { %p884_p3 = pnand %p883_p2, %p877_p13 }
  0x42   :  { %887 = shalt.err (!%p884_p3)
}
  0x43   :  { %73 = dma.hbm_to_vmem [thread:$0]  %s1126_s7, 2048, %s1015_s17, [#allocation9], %s920_s21, %s920_s21, %s921_s22  }
  0x44   :  { %910 = dma.done.wait [#allocation3], 2048  }
  0x45   :  { %911 = vsyncadd [#allocation3], 4294965248 }
  0x46   :  { %912 = dma.done.wait [#allocation6], 4096  }
  0x47   :  { %913 = vsyncadd [#allocation6], 4294963200 }
  0x48   :  { %914 = dma.done.wait [#allocation9], 2048  }
  0x49   :  { %915 = vsyncadd [#allocation9], 4294965248  ;;  %v924_v0 = vmov 0.0|0.0   ;;  %vm925_vm0 = vmmov 0   ;;  %v926_v1 = vmov 0.0   ;;  %v89_v2 = vld [vmem:[#allocation2] sm:$0xff] }
  0x4a   :  { %694 = vmatprep.subr.bf16.mxu0 %v924_v0  ;;  %586 = vmatprep.mubr.msk.f32.mxu0 %vm925_vm0, %v926_v1  ;;  %v90_v3 = vld [vmem:[#allocation2 + $0x8] sm:$0xff]  ;;  %v91_v4 = vld [vmem:[#allocation2 + $0x10] sm:$0xff]  ;;  %v92_v6 = vld [vmem:[#allocation2 + $0x18] sm:$0xff]  ;;  %s927_s20 = smov [#allocation10]  }
  0x4b   :  { %718 = vmatprep.subr.bf16.mxu1 %v924_v0  ;;  %621 = vmatprep.mubr.msk.f32.mxu1 %vm925_vm0, %v926_v1  ;;  %v695_v5 = vpack.c.bf16 %v90_v3, %v89_v2  ;;  %v698_v7 = vpack.c.bf16 %v92_v6, %v91_v4  ;;  %v93_v8 = vld [vmem:[#allocation2 + $0x20] sm:$0xff]  ;;  %v94_v9 = vld [vmem:[#allocation2 + $0x28] sm:$0xff]  ;;  %v185_v12 = vld [vmem:[#allocation5 + $0x10] sm:$0xff]  ;;  %s471_s23 = sshll.u32 %s927_s20, 4  ;;  %s472_s23 = int_to_ptr.vmem [resolvable:$true] %s471_s23 }
  0x4c   :  { %v183_v10 = vld [vmem:[#allocation5] sm:$0xff]  ;;  %v184_v11 = vld [vmem:[#allocation5 + $0x8] sm:$0xff]  ;;  %v186_v13 = vld [vmem:[#allocation5 + $0x18] sm:$0xff]  ;;  %v701_v14 = vpack.c.bf16 %v94_v9, %v93_v8  ;;  %s888_s24 = scalar_lea.vmem %s472_s23, 128  ;;  %p893_p5 = scmp.lt.s32.totalorder %s472_s23, %s472_s23 }
  0x4d   :  { %696 = vmatpush3.bf16.msra.mxu0 %v695_v5  ;;  %v719_v15 = vpack.c.bf16 %v184_v11, %v183_v10  ;;  %v95_v16 = vld [vmem:[#allocation2 + $0x30] sm:$0xff]  ;;  %v96_v17 = vld [vmem:[#allocation2 + $0x38] sm:$0xff]  ;;  %v722_v18 = vpack.c.bf16 %v186_v13, %v185_v12  ;;  %v187_v19 = vld [vmem:[#allocation5 + $0x20] sm:$0xff]  ;;  %p889_p4 = scmp.ne.s32.totalorder %s472_s23, %s888_s24  ;;  %p894_p6 = scmp.lt.s32.totalorder %s888_s24, %s888_s24 }
  0x4e   :  { %697 = vmatprep.subr.bf16.mxu0 %v924_v0  ;;  %v188_v20 = vld [vmem:[#allocation5 + $0x28] sm:$0xff]  ;;  %v704_v21 = vpack.c.bf16 %v96_v17, %v95_v16  ;;  %v97_v22 = vld [vmem:[#allocation2 + $0x40] sm:$0xff]  ;;  %v189_v25 = vld [vmem:[#allocation5 + $0x30] sm:$0xff] }
  0x4f   :  { %720 = vmatpush3.bf16.msra.mxu1 %v719_v15  ;;  %v98_v23 = vld [vmem:[#allocation2 + $0x48] sm:$0xff]  ;;  %v725_v24 = vpack.c.bf16 %v188_v20, %v187_v19  ;;  %v190_v26 = vld [vmem:[#allocation5 + $0x38] sm:$0xff]  ;;  %v99_v28 = vld [vmem:[#allocation2 + $0x50] sm:$0xff]  ;;  %p895_p7 = por %p894_p6, %p893_p5 }
  0x50   :  { %721 = vmatprep.subr.bf16.mxu1 %v924_v0  ;;  %v707_v27 = vpack.c.bf16 %v98_v23, %v97_v22  ;;  %v100_v29 = vld [vmem:[#allocation2 + $0x58] sm:$0xff]  ;;  %v728_v30 = vpack.c.bf16 %v190_v26, %v189_v25  ;;  %v191_v31 = vld [vmem:[#allocation5 + $0x40] sm:$0xff]  ;;  %v192_v32 = vld [vmem:[#allocation5 + $0x48] sm:$0xff] }
  0x51   :  { %699 = vmatpush3.bf16.msra.mxu0 %v698_v7  ;;  %v710_v33 = vpack.c.bf16 %v100_v29, %v99_v28  ;;  %v101_v34 = vld [vmem:[#allocation2 + $0x60] sm:$0xff]  ;;  %v102_v35 = vld [vmem:[#allocation2 + $0x68] sm:$0xff]  ;;  %v731_v36 = vpack.c.bf16 %v192_v32, %v191_v31  ;;  %v193_v37 = vld [vmem:[#allocation5 + $0x50] sm:$0xff]  ;;  %p896_p8 = pnand %p895_p7, %p889_p4 }
  0x52   :  { %700 = vmatprep.subr.bf16.mxu0 %v924_v0  ;;  %v194_v38 = vld [vmem:[#allocation5 + $0x58] sm:$0xff]  ;;  %v713_v39 = vpack.c.bf16 %v102_v35, %v101_v34  ;;  %v103_v40 = vld [vmem:[#allocation2 + $0x70] sm:$0xff]  ;;  %v195_v43 = vld [vmem:[#allocation5 + $0x60] sm:$0xff] }
  0x53   :  { %723 = vmatpush3.bf16.msra.mxu1 %v722_v18  ;;  %v104_v41 = vld [vmem:[#allocation2 + $0x78] sm:$0xff]  ;;  %v734_v42 = vpack.c.bf16 %v194_v38, %v193_v37  ;;  %v196_v44 = vld [vmem:[#allocation5 + $0x68] sm:$0xff]  ;;  %v88_v47 = vld [vmem:[%s1119_s0] sm:$0xff] }
  0x54   :  { %724 = vmatprep.subr.bf16.mxu1 %v924_v0  ;;  %v716_v45 = vpack.c.bf16 %v104_v41, %v103_v40  ;;  %v737_v46 = vpack.c.bf16 %v196_v44, %v195_v43  ;;  %v197_v48 = vld [vmem:[#allocation5 + $0x70] sm:$0xff]  ;;  %v198_v49 = vld [vmem:[#allocation5 + $0x78] sm:$0xff]  ;;  %v277_v51 = vld [vmem:[#allocation7] sm:$0xff] }
  0x55   :  { %702 = vmatpush3.bf16.msra.mxu0 %v701_v14  ;;  %v740_v50 = vpack.c.bf16 %v198_v49, %v197_v48  ;;  %v278_v52 = vld [vmem:[#allocation7 + $0x8] sm:$0xff]  ;;  %v279_v53 = vld [vmem:[#allocation7 + $0x10] sm:$0xff]  ;;  %v280_v55 = vld [vmem:[#allocation7 + $0x18] sm:$0xff] }
  0x56   :  { %703 = vmatprep.subr.bf16.mxu0 %v924_v0  ;;  %v743_v54 = vpack.c.bf16 %v278_v52, %v277_v51  ;;  %v746_v56 = vpack.c.bf16 %v280_v55, %v279_v53  ;;  %v281_v57 = vld [vmem:[#allocation7 + $0x20] sm:$0xff]  ;;  %v282_v58 = vld [vmem:[#allocation7 + $0x28] sm:$0xff]  ;;  %v283_v60 = vld [vmem:[#allocation7 + $0x30] sm:$0xff] }
  0x57   :  { %726 = vmatpush3.bf16.msra.mxu1 %v725_v24  ;;  %v749_v59 = vpack.c.bf16 %v282_v58, %v281_v57  ;;  %v284_v61 = vld [vmem:[#allocation7 + $0x38] sm:$0xff]  ;;  %v285_v63 = vld [vmem:[#allocation7 + $0x40] sm:$0xff]  ;;  %v286_v2 = vld [vmem:[#allocation7 + $0x48] sm:$0xff] }
  0x58   :  { %727 = vmatprep.subr.bf16.mxu1 %v924_v0  ;;  %v752_v62 = vpack.c.bf16 %v284_v61, %v283_v60  ;;  %v755_v3 = vpack.c.bf16 %v286_v2, %v285_v63  ;;  %v287_v4 = vld [vmem:[#allocation7 + $0x50] sm:$0xff]  ;;  %v288_v5 = vld [vmem:[#allocation7 + $0x58] sm:$0xff]  ;;  %v289_v7 = vld [vmem:[#allocation7 + $0x60] sm:$0xff] }
  0x59   :  { %705 = vmatpush3.bf16.msra.mxu0 %v704_v21  ;;  %v758_v6 = vpack.c.bf16 %v288_v5, %v287_v4  ;;  %v290_v8 = vld [vmem:[#allocation7 + $0x68] sm:$0xff]  ;;  %v482_v10 = vld [vmem:[%s1121_s2] ss:$0 sm:$0xff]  ;;  %v291_v15 = vld [vmem:[#allocation7 + $0x70] sm:$0xff] }
  0x5a   :  { %706 = vmatprep.subr.bf16.mxu0 %v924_v0  ;;  %v761_v9 = vpack.c.bf16 %v290_v8, %v289_v7  ;;  %v292_v16 = vld [vmem:[#allocation7 + $0x78] sm:$0xff]  ;;  %v371_v18 = vld [vmem:[#allocation8] sm:$0xff]  ;;  %v372_v19 = vld [vmem:[#allocation8 + $0x8] sm:$0xff] }
  0x5b   :  { %729 = vmatpush3.bf16.msra.mxu1 %v728_v30  ;;  %v764_v17 = vpack.c.bf16 %v292_v16, %v291_v15  ;;  %v373_v20 = vld [vmem:[#allocation8 + $0x10] sm:$0xff]  ;;  %v767_v21 = vpack.c.bf16 %v372_v19, %v371_v18  ;;  %v374_v22 = vld [vmem:[#allocation8 + $0x18] sm:$0xff]  ;;  %v375_v24 = vld [vmem:[#allocation8 + $0x20] sm:$0xff] }
  0x5c   :  { %730 = vmatprep.subr.bf16.mxu1 %v924_v0  ;;  %v770_v23 = vpack.c.bf16 %v374_v22, %v373_v20  ;;  %v376_v25 = vld [vmem:[#allocation8 + $0x28] sm:$0xff]  ;;  %v379_v29 = vld [vmem:[#allocation8 + $0x40] sm:$0xff]  ;;  %v381_v32 = vld [vmem:[#allocation8 + $0x50] sm:$0xff] }
  0x5d   :  { %708 = vmatpush3.bf16.msra.mxu0 %v707_v27  ;;  %v773_v26 = vpack.c.bf16 %v376_v25, %v375_v24  ;;  %v378_v27 = vld [vmem:[#allocation8 + $0x38] sm:$0xff]  ;;  %v380_v30 = vld [vmem:[#allocation8 + $0x48] sm:$0xff]  ;;  %v383_v35 = vld [vmem:[#allocation8 + $0x60] sm:$0xff] }
  0x5e   :  { %709 = vmatprep.subr.bf16.mxu0 %v924_v0  ;;  %v779_v31 = vpack.c.bf16 %v380_v30, %v379_v29  ;;  %v483_v38 = vld [vmem:[%s1123_s4] ss:$0 sm:$0xff]  ;;  %v385_v43 = vld [vmem:[#allocation8 + $0x70] sm:$0xff]  ;;  %v386_v44 = vld [vmem:[#allocation8 + $0x78] sm:$0xff] }
  0x5f   :  { %732 = vmatpush3.bf16.msra.mxu1 %v731_v36  ;;  %v384_v36 = vld [vmem:[#allocation8 + $0x68] sm:$0xff] }
  0x60   :  { %733 = vmatprep.subr.bf16.mxu1 %v924_v0  ;;  %v785_v37 = vpack.c.bf16 %v384_v36, %v383_v35 }
  0x61   :  { %711 = vmatpush3.bf16.msra.mxu0 %v710_v33  ;;  %v382_v33 = vld [vmem:[#allocation8 + $0x58] sm:$0xff] }
  0x62   :  { %712 = vmatprep.subr.bf16.mxu0 %v924_v0  ;;  %v782_v34 = vpack.c.bf16 %v382_v33, %v381_v32 }
  0x63   :  { %735 = vmatpush3.bf16.msra.mxu1 %v734_v42 }
  0x64   :  { %736 = vmatprep.subr.bf16.mxu1 %v924_v0 }
  0x65   :  { %714 = vmatpush3.bf16.msra.mxu0 %v713_v39 }
  0x66   :  { %715 = vmatprep.subr.bf16.mxu0 %v924_v0 }
  0x67   :  { %738 = vmatpush3.bf16.msra.mxu1 %v737_v46  ;;  %v484_v46 = vld [vmem:[%s1125_s6] ss:$0 sm:$0xff] }
  0x68   :  { %739 = vmatprep.subr.bf16.mxu1 %v924_v0 }
  0x69   :  { %717 = vmatpush3.bf16.msra.mxu0 %v716_v45  ;;  %v788_v45 = vpack.c.bf16 %v386_v44, %v385_v43 }
  0x6a   :  { %742 = vmatprep.subr.bf16.mxu0 %v924_v0 }
  0x6b   :  { %741 = vmatpush3.bf16.msra.mxu1 %v740_v50  ;;  %v485_v50 = vld [vmem:[%s1127_s8] ss:$0 sm:$0xff] }
  0x6c   :  { %587 = vmatmul.mubr.f32.vlgmr.msra.gmra.mrb[0].mxu0 %v88_v47  ;;  %766 = vmatprep.subr.bf16.mxu1 %v924_v0 }
  0x6d   :  { %656 = vmatprep.mubr.msk.f32.mxu0 %vm925_vm0, %v926_v1  ;;  %744 = vmatpush3.bf16.msra.mxu0 %v743_v54 }
  0x6e   :  { %745 = vmatprep.subr.bf16.mxu0 %v924_v0 }
  0x71   :  { %747 = vmatpush3.bf16.msra.mxu0 %v746_v56 }
  0x72   :  { %748 = vmatprep.subr.bf16.mxu0 %v924_v0 }
  0x75   :  { %750 = vmatpush3.bf16.msra.mxu0 %v749_v59 }
  0x76   :  { %751 = vmatprep.subr.bf16.mxu0 %v924_v0 }
  0x79   :  { %753 = vmatpush3.bf16.msra.mxu0 %v752_v62 }
  0x7a   :  { %754 = vmatprep.subr.bf16.mxu0 %v924_v0 }
  0x7d   :  { %756 = vmatpush3.bf16.msra.mxu0 %v755_v3 }
  0x7e   :  { %757 = vmatprep.subr.bf16.mxu0 %v924_v0 }
  0x81   :  { %759 = vmatpush3.bf16.msra.mxu0 %v758_v6 }
  0x82   :  { %760 = vmatprep.subr.bf16.mxu0 %v924_v0 }
  0x85   :  { %762 = vmatpush3.bf16.msra.mxu0 %v761_v9 }
  0x86   :  { %763 = vmatprep.subr.bf16.mxu0 %v924_v0 }
  0x89   :  { %765 = vmatpush3.bf16.msra.mxu0 %v764_v17 }
 0x13f   :  { %v178_v11 = vpop.f32.mrb[0].mxu0 }
 0x140   :  { %v179_v12 = vadd.f32 %v482_v10, %v178_v11  ;;  %v588_v13 = vpop.f32.mrb[1].mxu0 }
 0x142   :  { %v182_v14 = vmax.f32 %v179_v12, 0.0 }
 0x144   :  { %622 = vmatmul.mubr.f32.vlgmr.msra.gmra.mrb[0].mxu1 %v182_v14 }
 0x145   :  { %691 = vmatprep.mubr.msk.f32.mxu1 %vm925_vm0, %v926_v1  ;;  %768 = vmatpush3.bf16.msra.mxu1 %v767_v21  ;;  %v377_v1 = vld [vmem:[#allocation8 + $0x30] sm:$0xff] }
 0x146   :  { %769 = vmatprep.subr.bf16.mxu1 %v924_v0  ;;  %v776_v28 = vpack.c.bf16 %v378_v27, %v377_v1 }
 0x149   :  { %771 = vmatpush3.bf16.msra.mxu1 %v770_v23 }
 0x14a   :  { %772 = vmatprep.subr.bf16.mxu1 %v924_v0 }
 0x14d   :  { %774 = vmatpush3.bf16.msra.mxu1 %v773_v26 }
 0x14e   :  { %775 = vmatprep.subr.bf16.mxu1 %v924_v0 }
 0x151   :  { %777 = vmatpush3.bf16.msra.mxu1 %v776_v28 }
 0x152   :  { %778 = vmatprep.subr.bf16.mxu1 %v924_v0 }
 0x155   :  { %780 = vmatpush3.bf16.msra.mxu1 %v779_v31 }
 0x156   :  { %781 = vmatprep.subr.bf16.mxu1 %v924_v0 }
 0x159   :  { %783 = vmatpush3.bf16.msra.mxu1 %v782_v34 }
 0x15a   :  { %784 = vmatprep.subr.bf16.mxu1 %v924_v0 }
 0x15d   :  { %786 = vmatpush3.bf16.msra.mxu1 %v785_v37 }
 0x15e   :  { %787 = vmatprep.subr.bf16.mxu1 %v924_v0 }
 0x161   :  { %789 = vmatpush3.bf16.msra.mxu1 %v788_v45 }
 0x217   :  { %v272_v39 = vpop.f32.mrb[0].mxu1 }
 0x218   :  { %v273_v40 = vadd.f32 %v483_v38, %v272_v39  ;;  %v623_v41 = vpop.f32.mrb[1].mxu1 }
 0x21a   :  { %v276_v42 = vmax.f32 %v273_v40, 0.0 }
 0x21c   :  { %657 = vmatmul.mubr.f32.vlgmr.msra.gmra.mrb[2].mxu0 %v276_v42 }
 0x2ef   :  { %v366_v47 = vpop.f32.mrb[2].mxu0 }
 0x2f0   :  { %v367_v48 = vadd.f32 %v484_v46, %v366_v47  ;;  %v658_v0 = vpop.f32.mrb[3].mxu0 }
 0x2f2   :  { %v370_v49 = vmax.f32 %v367_v48, 0.0 }
 0x2f4   :  { %692 = vmatmul.mubr.f32.vlgmr.msra.gmra.mrb[2].mxu1 %v370_v49 }
 0x3c7   :  { %v460_v51 = vpop.f32.mrb[2].mxu1 }
 0x3c8   :  { %v461_v52 = vadd.f32 %v485_v50, %v460_v51  ;;  %v693_v53 = vpop.f32.mrb[3].mxu1 }
 0x3ca   :  { %464 = vst [vmem:[#allocation10] sm:$0xff] %v461_v52 }
 0x3cb   :  { %899 = shalt.err (!%p896_p8)
}
 0x3cc   :  { %s900_s26 = scalar_lea.hbm %s1128_s9, 128 }
 0x3cd   :  { %p901_p9 = scmp.ne.s32.totalorder %s1128_s9, %s900_s26  ;;  %p904_p10 = scmp.lt.u32.totalorder %s900_s26, %s1128_s9 }
 0x3cf   :  { %p906_p11 = pnand %p904_p10, %p901_p9 }
 0x3d1   :  { %909 = shalt.err (!%p906_p11)
}
 0x3d2   :  { %474 = dma.vmem_to_hbm [thread:$0]  %s472_s23, 128, %s1128_s9, [#allocation4]  }
 0x3d3   :  { %916 = dma.done.wait [#allocation4], 128  }
 0x3d4   :  { %917 = vsyncadd [#allocation4], 4294967168 }
 0x3d5   :  { %478 = vsyncpa [#allocation3], 1 }
 0x3d6   :  { %479 = vsyncpa [#allocation6], 1 }
 0x3d7   :  { %480 = vsyncpa [#allocation9], 1 }
 0x3d8   :  { %481 = vsyncpa [#allocation4], 1 }

</bundles_post_ra>
